<compile_context>
chip_gen: v5e
topology: v5e:2x2
jax: 0.10.0
libtpu: 0.0.40
codegen_flags: <defaults>
</compile_context>

<pallas_src>
import math
import jax
import jax.numpy as jnp
from jax.experimental import pallas as pl
from jax.experimental.pallas import tpu as pltpu


def _round_up(a, b):
    return (a + b - 1) // b * b


# -----------------------------------------------------------------------------
# Kernel
# -----------------------------------------------------------------------------
def resnet_backbone_kernel(
    x_ref, wf_ref, vh_ref, vi_ref,
    w00_ref, w01_ref, w10_ref, w11_ref,
    out_ref,
):
    # Packed per-feature vectors (all f32), loaded once per grid step.
    vh = vh_ref[...]                     # (8, H):  bf, b01, b11, sL, tL
    vi = vi_ref[...]                     # (8, Ip): b00', b10'
    bf = vh[0:1]
    b01 = vh[1:2]
    b11 = vh[2:3]
    sL = vh[3:4]
    tL = vh[4:5]
    b00 = vi[0:1]
    b10 = vi[1:2]

    # first_layer: x @ Wf + bf   (bf16 MXU inputs, f32 accumulate)
    x = jnp.dot(x_ref[...].astype(jnp.bfloat16), wf_ref[...],
                preferred_element_type=jnp.float32) + bf

    def residual_block(x, w0_ref, b0, w1_ref, b1):
        # BatchNorm (eval) already folded into w0/b0 at prep time.
        z = jnp.dot(x.astype(jnp.bfloat16), w0_ref[...],
                    preferred_element_type=jnp.float32) + b0
        z = jnp.maximum(z, 0.0)
        # dropout(hdo): identity in eval mode
        z = jnp.dot(z.astype(jnp.bfloat16), w1_ref[...],
                    preferred_element_type=jnp.float32) + b1
        # dropout(rdo): identity in eval mode
        return x + z

    x = residual_block(x, w00_ref, b00, w01_ref, b01)
    x = residual_block(x, w10_ref, b10, w11_ref, b11)

    # last_normalization (eval, folded to affine) + ReLU  (f32 VPU epilogue)
    out_ref[...] = jnp.maximum(x * sL + tL, 0.0)


# -----------------------------------------------------------------------------
# Parameter construction (mimics PyTorch module defaults) and kernel-side prep
# -----------------------------------------------------------------------------
def init_params(key, input_len, hidden_size, inner_hidden, eps=1e-5):
    """Deterministic f32 parameters with PyTorch-like shapes/ranges."""
    keys = jax.random.split(key, 6)

    def linear(k, fan_in, fan_out):
        k1, k2 = jax.random.split(k)
        bound = 1.0 / math.sqrt(fan_in)
        w = jax.random.uniform(k1, (fan_in, fan_out), jnp.float32, -bound, bound)
        b = jax.random.uniform(k2, (1, fan_out), jnp.float32, -bound, bound)
        return w, b

    def bn_fold(num_features):
        # Fresh BatchNorm1d (eval): gamma=1, beta=0, running_mean=0, running_var=1
        gamma = jnp.ones((1, num_features), jnp.float32)
        beta = jnp.zeros((1, num_features), jnp.float32)
        running_mean = jnp.zeros((1, num_features), jnp.float32)
        running_var = jnp.ones((1, num_features), jnp.float32)
        scale = gamma / jnp.sqrt(running_var + eps)
        shift = beta - running_mean * scale
        return scale, shift

    wf, bf = linear(keys[0], input_len, hidden_size)
    w00, b00 = linear(keys[1], hidden_size, inner_hidden)
    w01, b01 = linear(keys[2], inner_hidden, hidden_size)
    w10, b10 = linear(keys[3], hidden_size, inner_hidden)
    w11, b11 = linear(keys[4], inner_hidden, hidden_size)
    s0, t0 = bn_fold(hidden_size)
    s1, t1 = bn_fold(hidden_size)
    sL, tL = bn_fold(hidden_size)

    return dict(wf=wf, bf=bf,
                s0=s0, t0=t0, w00=w00, b00=b00, w01=w01, b01=b01,
                s1=s1, t1=t1, w10=w10, b10=b10, w11=w11, b11=b11,
                sL=sL, tL=tL)


def prepare_kernel_params(p):
    """Fold eval BN into linear0, pad inner dim to a multiple of 128,
    cast weights to bf16, pack the small per-feature vectors."""
    H = p['wf'].shape[1]
    inner = p['w00'].shape[1]
    inner_pad = _round_up(inner, 128)          # 192 -> 256
    pad = inner_pad - inner

    def fold_block(s, t, w0, b0, w1, b1):
        # (x*s + t) @ w0 + b0  ==  x @ (s^T * w0) + (t @ w0 + b0)
        w0f = s.reshape(-1, 1) * w0            # (H, inner)
        b0f = t @ w0 + b0                      # (1, inner)
        w0f = jnp.pad(w0f, ((0, 0), (0, pad)))     # zero cols -> relu(0)=0
        b0f = jnp.pad(b0f, ((0, 0), (0, pad)))
        w1p = jnp.pad(w1, ((0, pad), (0, 0)))      # zero rows -> no contribution
        return w0f, b0f, w1p, b1

    w00, b00, w01, b01 = fold_block(p['s0'], p['t0'], p['w00'], p['b00'],
                                    p['w01'], p['b01'])
    w10, b10, w11, b11 = fold_block(p['s1'], p['t1'], p['w10'], p['b10'],
                                    p['w11'], p['b11'])

    vecH = jnp.zeros((8, H), jnp.float32)
    vecH = (vecH.at[0].set(p['bf'][0])
                 .at[1].set(b01[0])
                 .at[2].set(b11[0])
                 .at[3].set(p['sL'][0])
                 .at[4].set(p['tL'][0]))
    vecI = jnp.zeros((8, inner_pad), jnp.float32)
    vecI = vecI.at[0].set(b00[0]).at[1].set(b10[0])

    bf16 = jnp.bfloat16
    return dict(
        wf=p['wf'].astype(bf16),
        w00=w00.astype(bf16), w01=w01.astype(bf16),
        w10=w10.astype(bf16), w11=w11.astype(bf16),
        vecH=vecH, vecI=vecI,
    )


# -----------------------------------------------------------------------------
# Wrapper
# -----------------------------------------------------------------------------
def resnet_backbone_forward(x, kparams, *, tb=1024):
    """x: (B, input_len) f32. Returns (B, hidden_size) f32."""
    B, F = x.shape
    H = kparams['wf'].shape[1]
    I = kparams['w00'].shape[1]

    # Batch tile: multiple of 8 sublanes, capped at `tb` rows (VMEM-budgeted
    # against v7x's 64 MiB physical / 32 MiB scoped default).
    TB = min(tb, _round_up(B, 8))
    Bp = _round_up(B, TB)
    if Bp != B:
        x = jnp.pad(x, ((0, Bp - B), (0, 0)))
    grid = (Bp // TB,)

    weights = [kparams['wf'], kparams['vecH'], kparams['vecI'],
               kparams['w00'], kparams['w01'], kparams['w10'], kparams['w11']]

    in_specs = [pl.BlockSpec((TB, F), lambda i: (i, 0))]
    for w in weights:
        in_specs.append(pl.BlockSpec(w.shape, lambda i: (0, 0)))

    flops = 2 * Bp * (F * H + 2 * (H * I + I * H))
    bytes_accessed = (Bp * F * 4 + Bp * H * 4
                      + sum(int(w.size) * w.dtype.itemsize for w in weights))

    out = pl.pallas_call(
        resnet_backbone_kernel,
        out_shape=jax.ShapeDtypeStruct((Bp, H), jnp.float32),
        grid=grid,
        in_specs=in_specs,
        out_specs=pl.BlockSpec((TB, H), lambda i: (i, 0)),
        compiler_params=pltpu.CompilerParams(
            dimension_semantics=("parallel",),
            vmem_limit_bytes=32 * 1024 * 1024,
        ),
        cost_estimate=pl.CostEstimate(
            flops=int(flops), transcendentals=0, bytes_accessed=int(bytes_accessed)),
    )(x, *weights)

    return out[:B]


# -----------------------------------------------------------------------------
# References for numerical checking
# -----------------------------------------------------------------------------
def reference_forward_f32(x, params):
    """Pure-JAX f32 reference matching the PyTorch module (eval mode)."""
    x = x @ params['wf'] + params['bf']

    def block(x, s, t, w0, b0, w1, b1):
        z = x * s + t
        z = jnp.maximum(z @ w0 + b0, 0.0)
        z = z @ w1 + b1
        return x + z

    x = block(x, params['s0'], params['t0'], params['w00'], params['b00'],
              params['w01'], params['b01'])
    x = block(x, params['s1'], params['t1'], params['w10'], params['b10'],
              params['w11'], params['b11'])
    x = x * params['sL'] + params['tL']
    return jnp.maximum(x, 0.0)


def reference_forward_bf16(x, kp):
    """Pure-JAX reference that emulates the kernel's bf16-matmul math exactly."""
    vh, vi = kp['vecH'], kp['vecI']
    bf, b01, b11, sL, tL = vh[0:1], vh[1:2], vh[2:3], vh[3:4], vh[4:5]
    b00, b10 = vi[0:1], vi[1:2]

    def dot(a, w):
        return jnp.dot(a.astype(jnp.bfloat16), w, preferred_element_type=jnp.float32)

    x = dot(x, kp['wf']) + bf

    def block(x, w0, b0, w1, b1):
        z = jnp.maximum(dot(x, w0) + b0, 0.0)
        z = dot(z, w1) + b1
        return x + z

    x = block(x, kp['w00'], b00, kp['w01'], b01)
    x = block(x, kp['w10'], b10, kp['w11'], b11)
    return jnp.maximum(x * sL + tL, 0.0)


# -----------------------------------------------------------------------------
if __name__ == "__main__":
    # cfg analogous to the PyTorch module
    cfg = dict(regularization_coeff=0.5, capacity_coeff=0.5, input_len=32)
    hidden_size = int(cfg['capacity_coeff'] * 256)        # 128
    inner_hidden = int(hidden_size * 1.5)                  # 192 (padded to 256 in-kernel)
    input_len = cfg['input_len']                           # 32
    batch = 128

    key = jax.random.PRNGKey(0)
    k_params, k_x = jax.random.split(key)
    params = init_params(k_params, input_len, hidden_size, inner_hidden)
    kparams = prepare_kernel_params(params)
    x = jax.random.normal(k_x, (batch, input_len), jnp.float32)

    # Small tile here just to exercise a multi-step (grid=2) pipelined launch.
    out = resnet_backbone_forward(x, kparams, tb=64)
    out = jax.block_until_ready(out)
    assert out.shape == (batch, hidden_size)

    # Exact-math check vs a bf16-emulating reference.
    ref_bf16 = reference_forward_bf16(x, kparams)
    assert jnp.allclose(out, ref_bf16, atol=1e-4, rtol=1e-4), "mismatch vs bf16 reference"

    # Loose check vs the full-f32 module semantics (bf16 MXU rounding budget).
    ref_f32 = reference_forward_f32(x, params)
    assert jnp.allclose(out, ref_f32, atol=5e-2, rtol=5e-2), "mismatch vs f32 reference"

    print("KERNEL_OK")
</pallas_src>

<mosaic_0001>
module attributes {stable_mosaic.version = 11 : i64} {
  func.func @resnet_backbone_kernel(%arg0: i32, %arg1: memref<64x32xf32, #tpu.memory_space<vmem>>, %arg2: memref<32x128xbf16, #tpu.memory_space<vmem>>, %arg3: memref<8x128xf32, #tpu.memory_space<vmem>>, %arg4: memref<8x256xf32, #tpu.memory_space<vmem>>, %arg5: memref<128x256xbf16, #tpu.memory_space<vmem>>, %arg6: memref<256x128xbf16, #tpu.memory_space<vmem>>, %arg7: memref<128x256xbf16, #tpu.memory_space<vmem>>, %arg8: memref<256x128xbf16, #tpu.memory_space<vmem>>, %arg9: memref<64x128xf32, #tpu.memory_space<vmem>>) attributes {dimension_semantics = [#tpu.dimension_semantics<parallel>], iteration_bounds = array<i64: 2>, scalar_prefetch = 0 : i64, scratch_operands = 0 : i64, tpu.core_type = #tpu.core_type<tc>, window_params = [{transform_indices = @transform_0, window_bounds = array<i64: 64, 32>}, {pipeline_mode = #tpu.pipeline_mode<synchronous>, transform_indices = @transform_1, window_bounds = array<i64: 32, 128>}, {pipeline_mode = #tpu.pipeline_mode<synchronous>, transform_indices = @transform_2, window_bounds = array<i64: 8, 128>}, {pipeline_mode = #tpu.pipeline_mode<synchronous>, transform_indices = @transform_3, window_bounds = array<i64: 8, 256>}, {pipeline_mode = #tpu.pipeline_mode<synchronous>, transform_indices = @transform_4, window_bounds = array<i64: 128, 256>}, {pipeline_mode = #tpu.pipeline_mode<synchronous>, transform_indices = @transform_5, window_bounds = array<i64: 256, 128>}, {pipeline_mode = #tpu.pipeline_mode<synchronous>, transform_indices = @transform_6, window_bounds = array<i64: 128, 256>}, {pipeline_mode = #tpu.pipeline_mode<synchronous>, transform_indices = @transform_7, window_bounds = array<i64: 256, 128>}, {transform_indices = @transform_8, window_bounds = array<i64: 64, 128>}]} {
    %c0 = arith.constant 0 : index
    %c0_0 = arith.constant 0 : index
    %0 = vector.load %arg3[%c0, %c0_0] : memref<8x128xf32, #tpu.memory_space<vmem>>, vector<8x128xf32>
    %c0_1 = arith.constant 0 : index
    %c0_2 = arith.constant 0 : index
    %1 = vector.load %arg4[%c0_1, %c0_2] : memref<8x256xf32, #tpu.memory_space<vmem>>, vector<8x256xf32>
    %2 = vector.extract_strided_slice %0 {offsets = [0, 0], sizes = [1, 128], strides = [1, 1]} : vector<8x128xf32> to vector<1x128xf32>
    %3 = vector.extract_strided_slice %0 {offsets = [1, 0], sizes = [1, 128], strides = [1, 1]} : vector<8x128xf32> to vector<1x128xf32>
    %4 = vector.extract_strided_slice %0 {offsets = [2, 0], sizes = [1, 128], strides = [1, 1]} : vector<8x128xf32> to vector<1x128xf32>
    %5 = vector.extract_strided_slice %0 {offsets = [3, 0], sizes = [1, 128], strides = [1, 1]} : vector<8x128xf32> to vector<1x128xf32>
    %6 = vector.extract_strided_slice %0 {offsets = [4, 0], sizes = [1, 128], strides = [1, 1]} : vector<8x128xf32> to vector<1x128xf32>
    %7 = vector.extract_strided_slice %1 {offsets = [0, 0], sizes = [1, 256], strides = [1, 1]} : vector<8x256xf32> to vector<1x256xf32>
    %8 = vector.extract_strided_slice %1 {offsets = [1, 0], sizes = [1, 256], strides = [1, 1]} : vector<8x256xf32> to vector<1x256xf32>
    %c0_3 = arith.constant 0 : index
    %c0_4 = arith.constant 0 : index
    %9 = vector.load %arg1[%c0_3, %c0_4] : memref<64x32xf32, #tpu.memory_space<vmem>>, vector<64x32xf32>
    %10 = arith.truncf %9 : vector<64x32xf32> to vector<64x32xbf16>
    %c0_5 = arith.constant 0 : index
    %c0_6 = arith.constant 0 : index
    %11 = vector.load %arg2[%c0_5, %c0_6] : memref<32x128xbf16, #tpu.memory_space<vmem>>, vector<32x128xbf16>
    %cst = arith.constant dense<0.000000e+00> : vector<64x128xf32>
    %12 = tpu.matmul %10, %11, %cst {dimension_numbers = #tpu.dot_dimension_numbers<[1], [0], [0], [1], [0, 0, 1, 1], [], []>} : vector<64x32xbf16>, vector<32x128xbf16>, vector<64x128xf32> -> vector<64x128xf32>
    %13 = vector.broadcast %2 : vector<1x128xf32> to vector<64x128xf32>
    %14 = arith.addf %12, %13 : vector<64x128xf32>
    %15 = arith.truncf %14 : vector<64x128xf32> to vector<64x128xbf16>
    %c0_7 = arith.constant 0 : index
    %c0_8 = arith.constant 0 : index
    %16 = vector.load %arg5[%c0_7, %c0_8] : memref<128x256xbf16, #tpu.memory_space<vmem>>, vector<128x256xbf16>
    %cst_9 = arith.constant dense<0.000000e+00> : vector<64x256xf32>
    %17 = tpu.matmul %15, %16, %cst_9 {dimension_numbers = #tpu.dot_dimension_numbers<[1], [0], [0], [1], [0, 0, 1, 1], [], []>} : vector<64x128xbf16>, vector<128x256xbf16>, vector<64x256xf32> -> vector<64x256xf32>
    %18 = vector.broadcast %7 : vector<1x256xf32> to vector<64x256xf32>
    %19 = arith.addf %17, %18 : vector<64x256xf32>
    %cst_10 = arith.constant 0.000000e+00 : f32
    %20 = vector.broadcast %cst_10 : f32 to vector<64x256xf32>
    %21 = arith.maximumf %19, %20 : vector<64x256xf32>
    %22 = arith.truncf %21 : vector<64x256xf32> to vector<64x256xbf16>
    %c0_11 = arith.constant 0 : index
    %c0_12 = arith.constant 0 : index
    %23 = vector.load %arg6[%c0_11, %c0_12] : memref<256x128xbf16, #tpu.memory_space<vmem>>, vector<256x128xbf16>
    %cst_13 = arith.constant dense<0.000000e+00> : vector<64x128xf32>
    %24 = tpu.matmul %22, %23, %cst_13 {dimension_numbers = #tpu.dot_dimension_numbers<[1], [0], [0], [1], [0, 0, 1, 1], [], []>} : vector<64x256xbf16>, vector<256x128xbf16>, vector<64x128xf32> -> vector<64x128xf32>
    %25 = vector.broadcast %3 : vector<1x128xf32> to vector<64x128xf32>
    %26 = arith.addf %24, %25 : vector<64x128xf32>
    %27 = arith.addf %14, %26 : vector<64x128xf32>
    %28 = arith.truncf %27 : vector<64x128xf32> to vector<64x128xbf16>
    %c0_14 = arith.constant 0 : index
    %c0_15 = arith.constant 0 : index
    %29 = vector.load %arg7[%c0_14, %c0_15] : memref<128x256xbf16, #tpu.memory_space<vmem>>, vector<128x256xbf16>
    %cst_16 = arith.constant dense<0.000000e+00> : vector<64x256xf32>
    %30 = tpu.matmul %28, %29, %cst_16 {dimension_numbers = #tpu.dot_dimension_numbers<[1], [0], [0], [1], [0, 0, 1, 1], [], []>} : vector<64x128xbf16>, vector<128x256xbf16>, vector<64x256xf32> -> vector<64x256xf32>
    %31 = vector.broadcast %8 : vector<1x256xf32> to vector<64x256xf32>
    %32 = arith.addf %30, %31 : vector<64x256xf32>
    %cst_17 = arith.constant 0.000000e+00 : f32
    %33 = vector.broadcast %cst_17 : f32 to vector<64x256xf32>
    %34 = arith.maximumf %32, %33 : vector<64x256xf32>
    %35 = arith.truncf %34 : vector<64x256xf32> to vector<64x256xbf16>
    %c0_18 = arith.constant 0 : index
    %c0_19 = arith.constant 0 : index
    %36 = vector.load %arg8[%c0_18, %c0_19] : memref<256x128xbf16, #tpu.memory_space<vmem>>, vector<256x128xbf16>
    %cst_20 = arith.constant dense<0.000000e+00> : vector<64x128xf32>
    %37 = tpu.matmul %35, %36, %cst_20 {dimension_numbers = #tpu.dot_dimension_numbers<[1], [0], [0], [1], [0, 0, 1, 1], [], []>} : vector<64x256xbf16>, vector<256x128xbf16>, vector<64x128xf32> -> vector<64x128xf32>
    %38 = vector.broadcast %4 : vector<1x128xf32> to vector<64x128xf32>
    %39 = arith.addf %37, %38 : vector<64x128xf32>
    %40 = arith.addf %27, %39 : vector<64x128xf32>
    %41 = vector.broadcast %5 : vector<1x128xf32> to vector<64x128xf32>
    %42 = arith.mulf %40, %41 : vector<64x128xf32>
    %43 = vector.broadcast %6 : vector<1x128xf32> to vector<64x128xf32>
    %44 = arith.addf %42, %43 : vector<64x128xf32>
    %cst_21 = arith.constant 0.000000e+00 : f32
    %45 = vector.broadcast %cst_21 : f32 to vector<64x128xf32>
    %46 = arith.maximumf %44, %45 : vector<64x128xf32>
    %c0_22 = arith.constant 0 : index
    %c0_23 = arith.constant 0 : index
    %47 = vector.load %arg9[%c0_22, %c0_23] : memref<64x128xf32, #tpu.memory_space<vmem>>, vector<64x128xf32>
    tpu.vector_store %arg9[%c0_22, %c0_23], %46 {strides = array<i32>} : memref<64x128xf32, #tpu.memory_space<vmem>>, vector<64x128xf32>,
    return
  }
  func.func @transform_0(%arg0: i32) -> (i32, i32) {
    %c0_i32 = arith.constant 0 : i32
    %c0_i32_0 = arith.constant 0 : i32
    return %arg0, %c0_i32 : i32, i32
  }
  func.func @transform_1(%arg0: i32) -> (i32, i32) {
    %c0_i32 = arith.constant 0 : i32
    %c0_i32_0 = arith.constant 0 : i32
    %c0_i32_1 = arith.constant 0 : i32
    return %c0_i32, %c0_i32_0 : i32, i32
  }
  func.func @transform_2(%arg0: i32) -> (i32, i32) {
    %c0_i32 = arith.constant 0 : i32
    %c0_i32_0 = arith.constant 0 : i32
    %c0_i32_1 = arith.constant 0 : i32
    return %c0_i32, %c0_i32_0 : i32, i32
  }
  func.func @transform_3(%arg0: i32) -> (i32, i32) {
    %c0_i32 = arith.constant 0 : i32
    %c0_i32_0 = arith.constant 0 : i32
    %c0_i32_1 = arith.constant 0 : i32
    return %c0_i32, %c0_i32_0 : i32, i32
  }
  func.func @transform_4(%arg0: i32) -> (i32, i32) {
    %c0_i32 = arith.constant 0 : i32
    %c0_i32_0 = arith.constant 0 : i32
    %c0_i32_1 = arith.constant 0 : i32
    return %c0_i32, %c0_i32_0 : i32, i32
  }
  func.func @transform_5(%arg0: i32) -> (i32, i32) {
    %c0_i32 = arith.constant 0 : i32
    %c0_i32_0 = arith.constant 0 : i32
    %c0_i32_1 = arith.constant 0 : i32
    return %c0_i32, %c0_i32_0 : i32, i32
  }
  func.func @transform_6(%arg0: i32) -> (i32, i32) {
    %c0_i32 = arith.constant 0 : i32
    %c0_i32_0 = arith.constant 0 : i32
    %c0_i32_1 = arith.constant 0 : i32
    return %c0_i32, %c0_i32_0 : i32, i32
  }
  func.func @transform_7(%arg0: i32) -> (i32, i32) {
    %c0_i32 = arith.constant 0 : i32
    %c0_i32_0 = arith.constant 0 : i32
    %c0_i32_1 = arith.constant 0 : i32
    return %c0_i32, %c0_i32_0 : i32, i32
  }
  func.func @transform_8(%arg0: i32) -> (i32, i32) {
    %c0_i32 = arith.constant 0 : i32
    %c0_i32_0 = arith.constant 0 : i32
    return %arg0, %c0_i32 : i32, i32
  }
}

</mosaic_0001>

<bundles_post_ra>
// kernel: tpu_custom_call.1
= control target key start
LH: loop header
LB: loop body
LE: loop exit
PB: predicated region body
PF: predicated region fallthrough
CT: control target
= control target key end

     0   :  { %s2459_s0 = inlined_call_operand.vmem [shape: f32[128,32], index: 0, kind: input, shape index: {}]   ;;  %s2460_s1 = inlined_call_operand.vmem [shape: bf16[32,128], index: 1, kind: input, shape index: {}]   ;;  %s2461_s2 = inlined_call_operand.hbm [shape: f32[8,128], index: 2, kind: input, shape index: {}]   ;;  %s2462_s3 = inlined_call_operand.vmem [shape: f32[8,256], index: 3, kind: input, shape index: {}]   ;;  %s2463_s4 = inlined_call_operand.vmem [shape: bf16[128,256], index: 4, kind: input, shape index: {}]   ;;  %s2464_s5 = inlined_call_operand.hbm [shape: bf16[256,128], index: 5, kind: input, shape index: {}]   ;;  %s2465_s6 = inlined_call_operand.hbm [shape: bf16[128,256], index: 6, kind: input, shape index: {}]   ;;  %s2466_s7 = inlined_call_operand.hbm [shape: bf16[256,128], index: 7, kind: input, shape index: {}]   ;;  %s2467_s8 = inlined_call_operand.hbm [shape: f32[128,128], index: 8, kind: output, shape index: {}]  }
   0x1   :  { %2471 = sst [smem:[#allocation18_spill]] %s2461_s2 }
   0x2   :  { %2472 = sst [smem:[#allocation19_spill]] %s2464_s5 }
   0x3   :  { %13 = vsyncpa [#allocation3], 0 }
   0x4   :  { %14 = vsyncpa [#allocation6], 0 }
   0x5   :  { %15 = vsyncpa [#allocation9], 0 }
   0x6   :  { %16 = vsyncpa [#allocation4], 0 }
   0x7   :  { %18 = vsyncpa [#allocation4 + $0x1], 0  ;;  %s2052_s27 = smov 0   ;;  %s2054_s28 = smov 0  }
   0x8   :  { %s2056_s29 = smov 0   ;;  %s2058_s30 = smov 0  }
   0x9 LB: > { %2473 = sst [smem:[#allocation15_spill]] %s1991_s29  ;;  %s2073_s9 = sadd.s32 4294967295, %s1995_s30   ;;  %s1995_s30 = sphi %s2058_s30, %s2482_s30   ;;  %s1991_s29 = sphi %s2056_s29, %s2484_s29   ;;  %s1987_s28 = sphi %s2054_s28, %s2486_s28   ;;  %s1983_s27 = sphi %s2052_s27, %s2485_s27  }
   0xa   : > { %s1358_s10 = sadd.s32 4294967294, %s1995_s30   ;;  %s2077_s11 = sadd.s32 1, %s1995_s30  }
   0xb   : > { %2474 = sst [smem:[#allocation16_spill]] %s2077_s11  ;;  %s204_s12 = sadd.s32 1, %s1991_s29 }
   0xc   : > { %s201_s13 = ssub.s32 %s1995_s30, %s2077_s11  ;;  %p214_p0 = scmp.ne.s32.totalorder %s1991_s29, %s1987_s28 }
   0xd   : > { %p202_p1 = scmp.eq.s32.totalorder %s201_s13, 0  ;;  %p215_p2 = scmp.eq.s32.totalorder %s2073_s9, 1 }
   0xe   : > { %p220_p3 = scmp.ne.s32.totalorder %s1987_s28, %s1983_s27  ;;  %p221_p4 = scmp.eq.s32.totalorder %s1358_s10, 1 }
   0xf   : > { %s2088_s14 = scalar_select %p202_p1, %s1991_s29, %s204_s12  }
  0x10   : > { %p2090_p5 = por %p215_p2, %p214_p0  ;;  %p2094_p6 = por %p221_p4, %p220_p3 }
  0x11   : > { %2475 = sst [smem:[#allocation17_spill]] %s2088_s14  ;;  %p1359_p7 = scmp.ge.s32.totalorder %s1995_s30, 1 }
  0x12   : > { %p228_p8 = scmp.lt.s32.totalorder %s1995_s30, 3  ;;  %p1750_p9 = scmp.eq.s32.totalorder %s2073_s9, 0 }
  0x13   : > { %s2479_s5 = sld [smem:[#allocation19_spill]]  ;;  %s1997_s21 = smov [#allocation5]  }
  0x14   : > { %p2101_p10 = pnand %p1359_p7, %p228_p8  ;;  %s262_s22 = sshll.u32 %s1997_s21, 4  ;;  %s263_s22 = int_to_ptr.vmem [resolvable:$true] %s262_s22 }
  0x15   : > { %s2481_s2 = sld [smem:[#allocation18_spill]]  ;;  %s1998_s10 = smov 64  }
  0x16   : > { %p1733_p11 = pneg %p2101_p10  ;;  %s1999_s12 = smov 4  }
  0x17   : > { %s2000_s13 = smov [#allocation2]   ;;  %s2001_s24 = smov [#allocation7]  }
  0x18   : > { %p2112_p12 = pnand %p1750_p9, %p1733_p11  ;;  %s245_s18 = sshll.u32 %s2000_s13, 4  ;;  %s246_s18 = int_to_ptr.vmem [resolvable:$true] %s245_s18 }
  0x19   : > { %s260_s20 = sshll.u32 %s2479_s5, 4  ;;  %s274_s5 = sshll.u32 %s2465_s6, 4  ;;  %s261_s20 = int_to_ptr.hbm [resolvable:$true] %s260_s20  ;;  %s275_s5 = int_to_ptr.hbm [resolvable:$true] %s274_s5 }
  0x1a   : > { %1739 = dma.hbm_to_vmem [thread:$0]  (!%p2112_p12), %s261_s20, 2048, %s263_s22, [#allocation6], %s1998_s10, %s1998_s10, %s1999_s12  }
  0x1b   : > { %s243_s26 = sshll.u32 %s2481_s2, 4  ;;  %s276_s25 = sshll.u32 %s2001_s24, 4  ;;  %s244_s26 = int_to_ptr.hbm [resolvable:$true] %s243_s26  ;;  %s277_s25 = int_to_ptr.vmem [resolvable:$true] %s276_s25 }
  0x1c   : > { %1736 = dma.hbm_to_vmem [thread:$0]  (!%p2112_p12), %s244_s26, 128, %s246_s18, [#allocation3]  }
  0x1d   : > { %s288_s29 = sshll.u32 %s2466_s7, 4  ;;  %s2002_s11 = smov 128   ;;  %s289_s29 = int_to_ptr.hbm [resolvable:$true] %s288_s29 }
  0x1e   : > { %s2003_s20 = smov 8   ;;  %s2004_s22 = smov [#allocation8]  }
  0x1f   : > { %1742 = dma.hbm_to_vmem [thread:$0]  (!%p2112_p12), %s275_s5, 2048, %s277_s25, [#allocation6], %s2002_s11, %s2002_s11, %s2003_s20  }
  0x20   : > { %s290_s13 = sshll.u32 %s2004_s22, 4  ;;  %315 = sbr.rel (%p2101_p10) target bundleno = 821 (0x335), region = 52  ;;  %s291_s13 = int_to_ptr.vmem [resolvable:$true] %s290_s13 }
  0x21   : > { %1745 = dma.hbm_to_vmem [thread:$0]  (!%p2112_p12), %s289_s29, 2048, %s291_s13, [#allocation9], %s1998_s10, %s1998_s10, %s1999_s12  }
  0x25   : > { %1966 = dma.done.wait (%p1750_p9), [#allocation3], 128  }
  0x26   : > { %1968 = vsyncadd (%p1750_p9), [#allocation3], 4294967168 }
  0x27   : > { %1970 = dma.done.wait (%p1750_p9), [#allocation6], 4096  }
  0x28   : > { %1972 = vsyncadd (%p1750_p9), [#allocation6], 4294963200 }
  0x29   : > { %1974 = dma.done.wait (%p1750_p9), [#allocation9], 2048  }
  0x2a   : > { %1976 = vsyncadd (%p1750_p9), [#allocation9], 4294965248  ;;  %s1371_s2 = sshll.u32 %s2073_s9, 3  ;;  %v1647_v0 = vld [vmem:[%s2460_s1 + $0x8] sm:$0xff]  ;;  %v1646_v1 = vld [vmem:[%s2460_s1] sm:$0xff]  ;;  %vm405_vm0 = vcmask 261120  }
  0x2b   : > { %p366_p13 = scmp.lt.s32.totalorder %s1371_s2, 15  ;;  %424 = vmatpush.bf16.msra.mxu0 %v1647_v0  ;;  %1713 = vmatpush.bf16.msra.mxu1 %v1647_v0  ;;  %v1443_v6 = vld [vmem:[%s2463_s4 + $0x70] sm:$0xf]  ;;  %v1663_v7 = vld [vmem:[%s2463_s4 + $0x74] sm:$0xf0]  ;;  %v2267_v63 = vld [vmem:[#allocation2] sm:$0xff] }
  0x2c   : > { %v1444_v8 = vor.u32 %v1663_v7, %v1443_v6  ;;  %v1662_v9 = vld [vmem:[%s2463_s4 + $0x74] sm:$0xf]  ;;  %v1445_v10 = vld [vmem:[%s2463_s4 + $0x78] sm:$0xf0]  ;;  %v1435_v11 = vld [vmem:[%s2463_s4 + $0x60] sm:$0xf] }
  0x2d   : > { %s2488_s2 = smov (!%p366_p13, %s1371_s2), 15  ;;  %v1448_v14 = vor.u32 %v1662_v9, %v1445_v10  ;;  %v1661_v15 = vld [vmem:[%s2463_s4 + $0x64] sm:$0xf0]  ;;  %v1660_v16 = vld [vmem:[%s2463_s4 + $0x64] sm:$0xf]  ;;  %v392_v0 = vperm.slane %v2267_v63, 0 }
  0x2e   : > { %s1372_s5 = sshll.u32 %s2488_s2, 3  ;;  %v1437_v17 = vld [vmem:[%s2463_s4 + $0x68] sm:$0xf0]  ;;  %v1436_v18 = vor.u32 %v1661_v15, %v1435_v11  ;;  %v1427_v20 = vld [vmem:[%s2463_s4 + $0x50] sm:$0xf]  ;;  %v1671_v11 = vld [vmem:[#allocation5 + $0x38] sm:$0xff] }
  0x2f   : > { %s2151_s14 = scalar_lea.vmem %s2459_s0, %s1372_s5  ;;  %425 = vmatpush.bf16.msra.mxu0 %v1646_v1  ;;  %1714 = vmatpush.bf16.msra.mxu1 %v1646_v1  ;;  %v1440_v19 = vor.u32 %v1660_v16, %v1437_v17  ;;  %v1659_v21 = vld [vmem:[%s2463_s4 + $0x54] sm:$0xf0]  ;;  %v1658_v22 = vld [vmem:[%s2463_s4 + $0x54] sm:$0xf]  ;;  %v1429_v23 = vld [vmem:[%s2463_s4 + $0x58] sm:$0xf0] }
  0x30   : > { %v376_v2 = vld [vmem:[%s2151_s14] sm:$0xff]  ;;  %v377_v3 = vld [vmem:[%s2151_s14 + $0x8] sm:$0xff]  ;;  %578 = vmatpush.bf16.msra.mxu2 %v1448_v14  ;;  %v1428_v24 = vor.u32 %v1659_v21, %v1427_v20  ;;  %v1432_v25 = vor.u32 %v1658_v22, %v1429_v23  ;;  %v1411_v32 = vld [vmem:[%s2463_s4 + $0x30] sm:$0xf]  ;;  %760 = vmatpush.bf16.msra.mxu3 %v1671_v11  ;;  %s362_s26 = sand.u32 1, %s1987_s28   ;;  %s1712_s18 = sshll.u32 %s2073_s9, 6 }
  0x31   : > { %v380_v4 = vld [vmem:[%s2151_s14 + $0x20] sm:$0xff]  ;;  %v381_v5 = vld [vmem:[%s2151_s14 + $0x28] sm:$0xff]  ;;  %v384_v12 = vpack.c.bf16 %v377_v3, %v376_v2  ;;  %v1655_v33 = vld [vmem:[%s2463_s4 + $0x34] sm:$0xf0]  ;;  %s1370_s10 = sshll.u32 %s362_s26, 6  ;;  %s1251_s24 = scalar_lea.hbm %s2467_s8, %s1712_s18 }
  0x32   : > { %v386_v13 = vpack.c.bf16 %v381_v5, %v380_v4  ;;  %v1419_v26 = vld [vmem:[%s2463_s4 + $0x40] sm:$0xf]  ;;  %v1657_v27 = vld [vmem:[%s2463_s4 + $0x44] sm:$0xf0]  ;;  %v1656_v28 = vld [vmem:[%s2463_s4 + $0x44] sm:$0xf]  ;;  %v1412_v40 = vor.u32 %v1655_v33, %v1411_v32 }
  0x33   : > { %549 = vmatpush.bf16.msrb.mxu1 %v1444_v8  ;;  %1381 = vmatmul.msk.bf16.vlgmr.msra.gmra.mxu0 %vm405_vm0, %v384_v12  ;;  %v1421_v29 = vld [vmem:[%s2463_s4 + $0x48] sm:$0xf0]  ;;  %v1420_v30 = vor.u32 %v1657_v27, %v1419_v26  ;;  %v1654_v34 = vld [vmem:[%s2463_s4 + $0x34] sm:$0xf]  ;;  %v1413_v35 = vld [vmem:[%s2463_s4 + $0x38] sm:$0xf0] }
  0x34   : > { %1383 = vmatmul.msk.bf16.vlgmr.msra.gmra.mxu1 %vm405_vm0, %v386_v13  ;;  %579 = vmatpush.bf16.msra.mxu2 %v1440_v19  ;;  %v1424_v31 = vor.u32 %v1656_v28, %v1421_v29  ;;  %v378_v36 = vld [vmem:[%s2151_s14 + $0x10] sm:$0xff]  ;;  %v379_v37 = vld [vmem:[%s2151_s14 + $0x18] sm:$0xff]  ;;  %v1416_v41 = vor.u32 %v1654_v34, %v1413_v35  ;;  %v1403_v44 = vld [vmem:[%s2463_s4 + $0x20] sm:$0xf]  ;;  %s2388_s12 = scalar_lea.vmem [#allocation10], %s1370_s10  ;;  %s1254_s20 = sshll.u32 %s1251_s24, 4  ;;  %s1255_s20 = int_to_ptr.hbm [resolvable:$true] %s1254_s20 }
  0x35   : > { %v382_v38 = vld [vmem:[%s2151_s14 + $0x30] sm:$0xff]  ;;  %v383_v39 = vld [vmem:[%s2151_s14 + $0x38] sm:$0xff]  ;;  %v385_v42 = vpack.c.bf16 %v379_v37, %v378_v36  ;;  %v1653_v45 = vld [vmem:[%s2463_s4 + $0x24] sm:$0xf0]  ;;  %s1252_s25 = sshll.u32 %s2388_s12, 4  ;;  %s1240_s9 = scalar_lea.sflag [#allocation4], %s362_s26  ;;  %s1253_s25 = int_to_ptr.vmem [resolvable:$true] %s1252_s25 }
  0x36   : > { %v387_v43 = vpack.c.bf16 %v383_v39, %v382_v38  ;;  %v1652_v46 = vld [vmem:[%s2463_s4 + $0x24] sm:$0xf]  ;;  %v1404_v47 = vor.u32 %v1653_v45, %v1403_v44  ;;  %v1405_v48 = vld [vmem:[%s2463_s4 + $0x28] sm:$0xf0]  ;;  %v1395_v50 = vld [vmem:[%s2463_s4 + $0x10] sm:$0xf] }
  0x37   : > { %550 = vmatpush.bf16.msrb.mxu1 %v1436_v18  ;;  %v1408_v49 = vor.u32 %v1652_v46, %v1405_v48  ;;  %v1651_v51 = vld [vmem:[%s2463_s4 + $0x14] sm:$0xf0]  ;;  %v1650_v52 = vld [vmem:[%s2463_s4 + $0x14] sm:$0xf]  ;;  %v1397_v54 = vld [vmem:[%s2463_s4 + $0x18] sm:$0xf0] }
  0x38   : > { %580 = vmatpush.bf16.msra.mxu2 %v1432_v25  ;;  %v1396_v53 = vor.u32 %v1651_v51, %v1395_v50  ;;  %v1400_v55 = vor.u32 %v1650_v52, %v1397_v54  ;;  %v1387_v56 = vld [vmem:[%s2463_s4] sm:$0xf]  ;;  %v1649_v57 = vld [vmem:[%s2463_s4 + $0x4] sm:$0xf0]  ;;  %v1648_v58 = vld [vmem:[%s2463_s4 + $0x4] sm:$0xf] }
  0x39   : > { %v1388_v59 = vor.u32 %v1649_v57, %v1387_v56  ;;  %v1389_v60 = vld [vmem:[%s2463_s4 + $0x8] sm:$0xf0]  ;;  %v1679_v12 = vld [vmem:[#allocation5 + $0x78] sm:$0xff]  ;;  %v1670_v13 = vld [vmem:[#allocation5 + $0x30] sm:$0xff]  ;;  %s1935_s22 = sshra.s32 %s1255_s20, 4  ;;  %s1941_s5 = scalar_lea.hbm %s2467_s8, 128  ;;  %s1936_s22 = int_to_ptr.hbm [resolvable:$true] %s1935_s22 }
  0x3a   : > { %v1392_v61 = vor.u32 %v1648_v58, %v1389_v60  ;;  %789 = vmatpush.bf16.msrb.mxu0 %v1679_v12  ;;  %v1678_v14 = vld [vmem:[#allocation5 + $0x70] sm:$0xff]  ;;  %761 = vmatpush.bf16.msra.mxu3 %v1670_v13  ;;  %v1669_v16 = vld [vmem:[#allocation5 + $0x28] sm:$0xff]  ;;  %v1668_v20 = vld [vmem:[#allocation5 + $0x20] sm:$0xff]  ;;  %s1937_s13 = scalar_lea.hbm %s1936_s22, 64  ;;  %p1942_p3 = scmp.lt.s32.totalorder %s1936_s22, %s2467_s8 }
  0x3b   : > { %551 = vmatpush.bf16.msrb.mxu1 %v1428_v24  ;;  %v1677_v17 = vld [vmem:[#allocation5 + $0x68] sm:$0xff]  ;;  %v1667_v27 = vld [vmem:[#allocation5 + $0x18] sm:$0xff]  ;;  %v1676_v28 = vld [vmem:[#allocation5 + $0x60] sm:$0xff]  ;;  %p1938_p0 = scmp.ne.s32.totalorder %s1936_s22, %s1937_s13  ;;  %p1943_p4 = scmp.lt.s32.totalorder %s1941_s5, %s1937_s13 }
  0x3c   : > { %581 = vmatpush.bf16.msra.mxu2 %v1424_v31  ;;  %v1666_v29 = vld [vmem:[#allocation5 + $0x10] sm:$0xff]  ;;  %v1665_v31 = vld [vmem:[#allocation5 + $0x8] sm:$0xff]  ;;  %v1664_v33 = vld [vmem:[#allocation5] sm:$0xff] }
  0x3d   : > { %v1674_v32 = vld [vmem:[#allocation5 + $0x50] sm:$0xff]  ;;  %v1673_v34 = vld [vmem:[#allocation5 + $0x48] sm:$0xff]  ;;  %v1672_v35 = vld [vmem:[#allocation5 + $0x40] sm:$0xff]  ;;  %p1939_p1 = pnand %p1938_p0, %p2090_p5  ;;  %p1944_p7 = por %p1943_p4, %p1942_p3 }
  0x3e   : > { %790 = vmatpush.bf16.msrb.mxu0 %v1678_v14  ;;  %762 = vmatpush.bf16.msra.mxu3 %v1669_v16  ;;  %v2297_v36 = vld [vmem:[%s2462_s3] sm:$0xff]  ;;  %v2305_v39 = vld [vmem:[%s2462_s3 + $0x8] sm:$0xff]  ;;  %v1694_v12 = vld [vmem:[#allocation7 + $0x74] sm:$0xf] }
  0x3f   : > { %552 = vmatpush.bf16.msrb.mxu1 %v1420_v30  ;;  %v1675_v30 = vld [vmem:[#allocation5 + $0x58] sm:$0xff]  ;;  %v2300_v38 = vperm.slane %v2297_v36, 0  ;;  %v1563_v16 = vld [vmem:[#allocation7 + $0x60] sm:$0xf]  ;;  %p1940_p2 = pneg %p1939_p1 }
  0x40   : > { %582 = vmatpush.bf16.msra.mxu2 %v1416_v41  ;;  %v1695_v11 = vld [vmem:[#allocation7 + $0x74] sm:$0xf0] }
  0x41   : > { %p1945_p8 = pnand %p1944_p7, %p1940_p2 }
  0x42   : > { %791 = vmatpush.bf16.msrb.mxu0 %v1677_v17  ;;  %763 = vmatpush.bf16.msra.mxu3 %v1668_v20  ;;  %v1693_v17 = vld [vmem:[#allocation7 + $0x64] sm:$0xf0] }
  0x43   : > { %553 = vmatpush.bf16.msrb.mxu1 %v1412_v40  ;;  %1382 = vmatmul.msk.bf16.gmra.mxu0 %vm405_vm0, %v385_v42 }
  0x44   : > { %1384 = vmatmul.msk.bf16.gmra.mxu1 %vm405_vm0, %v387_v43  ;;  %583 = vmatpush.bf16.msra.mxu2 %v1408_v49  ;;  %v2309_v43 = vperm.slane %v2305_v39, 0 }
  0x46   : > { %764 = vmatpush.bf16.msra.mxu3 %v1667_v27  ;;  %792 = vmatpush.bf16.msrb.mxu0 %v1676_v28  ;;  %v1564_v27 = vor.u32 %v1693_v17, %v1563_v16 }
  0x47   : > { %554 = vmatpush.bf16.msrb.mxu1 %v1404_v47 }
  0x48   : > { %584 = vmatpush.bf16.msra.mxu2 %v1400_v55 }
  0x4a   : > { %765 = vmatpush.bf16.msra.mxu3 %v1666_v29  ;;  %793 = vmatpush.bf16.msrb.mxu0 %v1675_v30  ;;  %v1555_v30 = vld [vmem:[#allocation7 + $0x50] sm:$0xf] }
  0x4b   : > { %555 = vmatpush.bf16.msrb.mxu1 %v1396_v53 }
  0x4c   : > { %585 = vmatpush.bf16.msra.mxu2 %v1392_v61 }
  0x4e   : > { %766 = vmatpush.bf16.msra.mxu3 %v1665_v31  ;;  %794 = vmatpush.bf16.msrb.mxu0 %v1674_v32  ;;  %v1691_v31 = vld [vmem:[#allocation7 + $0x54] sm:$0xf0]  ;;  %v1690_v32 = vld [vmem:[#allocation7 + $0x54] sm:$0xf] }
  0x4f   : > { %556 = vmatpush.bf16.msrb.mxu1 %v1388_v59 }
  0x52   : > { %767 = vmatpush.bf16.msra.mxu3 %v1664_v33  ;;  %795 = vmatpush.bf16.msrb.mxu0 %v1673_v34  ;;  %v1557_v33 = vld [vmem:[#allocation7 + $0x58] sm:$0xf0] }
  0x56   : > { %796 = vmatpush.bf16.msrb.mxu0 %v1672_v35 }
  0xb0   : > { %v427_v62 = vpop.f32.mrf.mxu0 }
  0xb1   : > { %v2270_v2 = vadd.f32 %v427_v62, %v392_v0  ;;  %v437_v6 = vpop.f32.mrf.mxu1 }
  0xb2   : > { %v2282_v18 = vadd.f32 %v437_v6, %v392_v0 }
  0xb8   : > { %v429_v1 = vpop.f32.mrf.mxu0 }
  0xb9   : > { %v2272_v3 = vadd.f32 %v429_v1, %v392_v0  ;;  %v439_v15 = vpop.f32.mrf.mxu1 }
  0xba   : > { %v2284_v19 = vadd.f32 %v439_v15, %v392_v0  ;;  %v1573_v15 = vld [vmem:[#allocation7 + $0x78] sm:$0xf0] }
  0xbb   : > { %v447_v4 = vpack.c.bf16 %v2272_v3, %v2270_v2 }
  0xbc   : > { %v449_v22 = vpack.c.bf16 %v2284_v19, %v2282_v18 }
  0xbd   : > { %557 = vmatmul.bf16.vlgmr.msrb.gmra.mxu1 %v447_v4  ;;  %586 = vmatmul.bf16.vlgmr.msra.gmra.mxu2 %v447_v4 }
  0xc0   : > { %v432_v5 = vpop.f32.mrf.mxu0 }
  0xc1   : > { %v2276_v8 = vadd.f32 %v432_v5, %v392_v0  ;;  %v442_v21 = vpop.f32.mrf.mxu1 }
  0xc2   : > { %v2288_v24 = vadd.f32 %v442_v21, %v392_v0  ;;  %v1576_v21 = vor.u32 %v1694_v12, %v1573_v15 }
  0xc4   : > { %957 = vmatpush.bf16.msrb.mxu2 %v1576_v21 }
  0xc8   : > { %v434_v7 = vpop.f32.mrf.mxu0 }
  0xc9   : > { %v2278_v9 = vadd.f32 %v434_v7, %v392_v0  ;;  %v444_v23 = vpop.f32.mrf.mxu1 }
  0xca   : > { %v2290_v25 = vadd.f32 %v444_v23, %v392_v0  ;;  %v1565_v23 = vld [vmem:[#allocation7 + $0x68] sm:$0xf0] }
  0xcb   : > { %v448_v10 = vpack.c.bf16 %v2278_v9, %v2276_v8 }
  0xcc   : > { %v450_v26 = vpack.c.bf16 %v2290_v25, %v2288_v24 }
  0xcd   : > { %562 = vmatmul.bf16.gmra.mxu1 %v448_v10  ;;  %591 = vmatmul.bf16.gmra.mxu2 %v448_v10  ;;  %v1571_v10 = vld [vmem:[#allocation7 + $0x70] sm:$0xf] }
  0xce   : > { %v1572_v14 = vor.u32 %v1695_v11, %v1571_v10 }
  0xd0   : > { %928 = vmatpush.bf16.msra.mxu1 %v1572_v14 }
  0xd4   : > { %929 = vmatpush.bf16.msra.mxu1 %v1564_v27  ;;  %v1683_v27 = vld [vmem:[#allocation7 + $0x14] sm:$0xf0] }
  0xdd   : > { %567 = vmatmul.bf16.gmra.mxu1 %v449_v22  ;;  %596 = vmatmul.bf16.gmra.mxu2 %v449_v22  ;;  %v1692_v22 = vld [vmem:[#allocation7 + $0x64] sm:$0xf] }
  0xde   : > { %v1568_v29 = vor.u32 %v1692_v22, %v1565_v23 }
  0xe0   : > { %958 = vmatpush.bf16.msrb.mxu2 %v1568_v29  ;;  %v1525_v29 = vld [vmem:[#allocation7 + $0x18] sm:$0xf0] }
  0xed   : > { %572 = vmatmul.bf16.gmra.mxu1 %v450_v26  ;;  %601 = vmatmul.bf16.gmra.mxu2 %v450_v26 }
 0x13a   : > { %v558_v37 = vpop.f32.mrf.mxu1 }
 0x13b   : > { %v559_v41 = vadd.f32 %v558_v37, %v2300_v38  ;;  %v1556_v37 = vor.u32 %v1691_v31, %v1555_v30  ;;  %v1515_v31 = vld [vmem:[#allocation7] sm:$0xf] }
 0x13d   : > { %v607_v45 = vmax.f32 %v559_v41, 0.0  ;;  %930 = vmatpush.bf16.msra.mxu1 %v1556_v37 }
 0x140   : > { %v587_v40 = vpop.f32.mrf.mxu2 }
 0x141   : > { %v588_v47 = vadd.f32 %v587_v40, %v2309_v43 }
 0x142   : > { %v560_v42 = vpop.f32.mrf.mxu1 }
 0x143   : > { %v561_v44 = vadd.f32 %v560_v42, %v2300_v38  ;;  %v608_v52 = vmax.f32 %v588_v47, 0.0  ;;  %v1560_v42 = vor.u32 %v1690_v32, %v1557_v33  ;;  %v1688_v47 = vld [vmem:[#allocation7 + $0x44] sm:$0xf]  ;;  %v1681_v32 = vld [vmem:[#allocation7 + $0x4] sm:$0xf0] }
 0x144   : > { %v1680_v33 = vld [vmem:[#allocation7 + $0x4] sm:$0xf] }
 0x145   : > { %v609_v46 = vmax.f32 %v561_v44, 0.0  ;;  %v1547_v44 = vld [vmem:[#allocation7 + $0x40] sm:$0xf]  ;;  %959 = vmatpush.bf16.msrb.mxu2 %v1560_v42 }
 0x147   : > { %v623_v48 = vpack.c.bf16 %v609_v46, %v607_v45  ;;  %v1689_v45 = vld [vmem:[#allocation7 + $0x44] sm:$0xf0] }
 0x148   : > { %v589_v49 = vpop.f32.mrf.mxu2 }
 0x149   : > { %v590_v50 = vadd.f32 %v589_v49, %v2309_v43  ;;  %768 = vmatmul.bf16.vlgmr.msra.gmra.mxu3 %v623_v48  ;;  %v1549_v48 = vld [vmem:[#allocation7 + $0x48] sm:$0xf0] }
 0x14a   : > { %v563_v51 = vpop.f32.mrf.mxu1 }
 0x14b   : > { %v610_v53 = vmax.f32 %v590_v50, 0.0  ;;  %v564_v56 = vadd.f32 %v563_v51, %v2300_v38  ;;  %v1548_v51 = vor.u32 %v1689_v45, %v1547_v44 }
 0x14d   : > { %v624_v54 = vpack.c.bf16 %v610_v53, %v608_v52  ;;  %v611_v59 = vmax.f32 %v564_v56, 0.0  ;;  %v1687_v56 = vld [vmem:[#allocation7 + $0x34] sm:$0xf0]  ;;  %931 = vmatpush.bf16.msra.mxu1 %v1548_v51 }
 0x14f   : > { %797 = vmatmul.bf16.vlgmr.msrb.gmra.mxu0 %v624_v54  ;;  %v1552_v54 = vor.u32 %v1688_v47, %v1549_v48 }
 0x150   : > { %v592_v55 = vpop.f32.mrf.mxu2 }
 0x151   : > { %v593_v61 = vadd.f32 %v592_v55, %v2309_v43  ;;  %v1539_v55 = vld [vmem:[#allocation7 + $0x30] sm:$0xf]  ;;  %960 = vmatpush.bf16.msrb.mxu2 %v1552_v54 }
 0x152   : > { %v565_v57 = vpop.f32.mrf.mxu1 }
 0x153   : > { %v566_v58 = vadd.f32 %v565_v57, %v2300_v38  ;;  %v612_v5 = vmax.f32 %v593_v61, 0.0  ;;  %v1686_v57 = vld [vmem:[#allocation7 + $0x34] sm:$0xf] }
 0x155   : > { %v613_v60 = vmax.f32 %v566_v58, 0.0  ;;  %v1541_v58 = vld [vmem:[#allocation7 + $0x38] sm:$0xf0] }
 0x156   : > { %v1544_v61 = vor.u32 %v1686_v57, %v1541_v58 }
 0x157   : > { %v625_v62 = vpack.c.bf16 %v613_v60, %v611_v59  ;;  %v1540_v60 = vor.u32 %v1687_v56, %v1539_v55 }
 0x158   : > { %v594_v0 = vpop.f32.mrf.mxu2  ;;  %961 = vmatpush.bf16.msrb.mxu2 %v1544_v61 }
 0x159   : > { %v595_v1 = vadd.f32 %v594_v0, %v2309_v43  ;;  %773 = vmatmul.bf16.gmra.mxu3 %v625_v62  ;;  %v1531_v62 = vld [vmem:[#allocation7 + $0x20] sm:$0xf]  ;;  %v1685_v0 = vld [vmem:[#allocation7 + $0x24] sm:$0xf0]  ;;  %932 = vmatpush.bf16.msra.mxu1 %v1540_v60 }
 0x15a   : > { %v568_v4 = vpop.f32.mrf.mxu1  ;;  %v1532_v10 = vor.u32 %v1685_v0, %v1531_v62  ;;  %v1703_v0 = vld [vmem:[#allocation8 + $0x38] sm:$0xff] }
 0x15b   : > { %v614_v6 = vmax.f32 %v595_v1, 0.0  ;;  %v569_v20 = vadd.f32 %v568_v4, %v2300_v38  ;;  %v1684_v4 = vld [vmem:[#allocation7 + $0x24] sm:$0xf]  ;;  %1139 = vmatpush.bf16.msrb.mxu3 %v1703_v0 }
 0x15d   : > { %v626_v7 = vpack.c.bf16 %v614_v6, %v612_v5  ;;  %v615_v34 = vmax.f32 %v569_v20, 0.0  ;;  %v1533_v5 = vld [vmem:[#allocation7 + $0x28] sm:$0xf0]  ;;  %933 = vmatpush.bf16.msra.mxu1 %v1532_v10 }
 0x15e   : > { %v1536_v12 = vor.u32 %v1684_v4, %v1533_v5  ;;  %v1702_v4 = vld [vmem:[#allocation8 + $0x30] sm:$0xff] }
 0x15f   : > { %802 = vmatmul.bf16.gmra.mxu0 %v626_v7  ;;  %v1710_v5 = vld [vmem:[#allocation8 + $0x70] sm:$0xff]  ;;  %1140 = vmatpush.bf16.msrb.mxu3 %v1702_v4 }
 0x160   : > { %v597_v13 = vpop.f32.mrf.mxu2  ;;  %962 = vmatpush.bf16.msrb.mxu2 %v1536_v12 }
 0x161   : > { %v598_v40 = vadd.f32 %v597_v13, %v2309_v43 }
 0x162   : > { %v570_v26 = vpop.f32.mrf.mxu1 }
 0x163   : > { %v571_v28 = vadd.f32 %v570_v26, %v2300_v38  ;;  %v616_v52 = vmax.f32 %v598_v40, 0.0  ;;  %v1523_v26 = vld [vmem:[#allocation7 + $0x10] sm:$0xf] }
 0x165   : > { %v617_v35 = vmax.f32 %v571_v28, 0.0  ;;  %v1524_v28 = vor.u32 %v1683_v27, %v1523_v26  ;;  %v1698_v27 = vld [vmem:[#allocation8 + $0x10] sm:$0xff] }
 0x167   : > { %v627_v41 = vpack.c.bf16 %v617_v35, %v615_v34  ;;  %934 = vmatpush.bf16.msra.mxu1 %v1524_v28  ;;  %v1516_v34 = vor.u32 %v1681_v32, %v1515_v31  ;;  %v1517_v35 = vld [vmem:[#allocation7 + $0x8] sm:$0xf0] }
 0x168   : > { %v599_v46 = vpop.f32.mrf.mxu2  ;;  %v1520_v37 = vor.u32 %v1680_v33, %v1517_v35 }
 0x169   : > { %v600_v49 = vadd.f32 %v599_v46, %v2309_v43  ;;  %778 = vmatmul.bf16.gmra.mxu3 %v627_v41  ;;  %v2327_v41 = vperm.slane %v2267_v63, 1 }
 0x16a   : > { %v573_v50 = vpop.f32.mrf.mxu1 }
 0x16b   : > { %v618_v53 = vmax.f32 %v600_v49, 0.0  ;;  %v574_v6 = vadd.f32 %v573_v50, %v2300_v38  ;;  %935 = vmatpush.bf16.msra.mxu1 %v1516_v34 }
 0x16d   : > { %v628_v59 = vpack.c.bf16 %v618_v53, %v616_v52  ;;  %v619_v13 = vmax.f32 %v574_v6, 0.0 }
 0x16f   : > { %807 = vmatmul.bf16.gmra.mxu0 %v628_v59 }
 0x170   : > { %v602_v1 = vpop.f32.mrf.mxu2 }
 0x171   : > { %v603_v15 = vadd.f32 %v602_v1, %v2309_v43  ;;  %v1711_v1 = vld [vmem:[#allocation8 + $0x78] sm:$0xff] }
 0x172   : > { %v575_v7 = vpop.f32.mrf.mxu1  ;;  %1168 = vmatpush.bf16.msra.mxu0 %v1711_v1 }
 0x173   : > { %v576_v11 = vadd.f32 %v575_v7, %v2300_v38  ;;  %v620_v21 = vmax.f32 %v603_v15, 0.0  ;;  %v1682_v38 = vld [vmem:[#allocation7 + $0x14] sm:$0xf]  ;;  %v1708_v15 = vld [vmem:[#allocation8 + $0x60] sm:$0xff] }
 0x174   : > { %v1528_v30 = vor.u32 %v1682_v38, %v1525_v29  ;;  %v1706_v38 = vld [vmem:[#allocation8 + $0x50] sm:$0xff] }
 0x175   : > { %v621_v14 = vmax.f32 %v576_v11, 0.0 }
 0x176   : > { %963 = vmatpush.bf16.msrb.mxu2 %v1528_v30  ;;  %1169 = vmatpush.bf16.msra.mxu0 %v1710_v5 }
 0x177   : > { %v629_v16 = vpack.c.bf16 %v621_v14, %v619_v13  ;;  %v1700_v14 = vld [vmem:[#allocation8 + $0x20] sm:$0xff] }
 0x178   : > { %v604_v17 = vpop.f32.mrf.mxu2 }
 0x179   : > { %v605_v20 = vadd.f32 %v604_v17, %v2309_v43  ;;  %783 = vmatmul.bf16.gmra.mxu3 %v629_v16 }
 0x17a   : > { %964 = vmatpush.bf16.msrb.mxu2 %v1520_v37  ;;  %v1696_v37 = vld [vmem:[#allocation8] sm:$0xff] }
 0x17b   : > { %v622_v22 = vmax.f32 %v605_v20, 0.0 }
 0x17d   : > { %v630_v23 = vpack.c.bf16 %v622_v22, %v620_v21  ;;  %v1699_v21 = vld [vmem:[#allocation8 + $0x18] sm:$0xff] }
 0x17e   : > { %v1707_v22 = vld [vmem:[#allocation8 + $0x58] sm:$0xff] }
 0x17f   : > { %812 = vmatmul.bf16.gmra.mxu0 %v630_v23 }
 0x1cc   : > { %v769_v43 = vpop.f32.mrf.mxu3  ;;  %v798_v40 = vpop.f32.mrf.mxu0 }
 0x1cd   : > { %v770_v42 = vadd.f32 %v769_v43, %v2327_v41  ;;  %v1705_v43 = vld [vmem:[#allocation8 + $0x48] sm:$0xff] }
 0x1cf   : > { %v799_v46 = vadd.f32 %v798_v40, %v770_v42  ;;  %v1704_v40 = vld [vmem:[#allocation8 + $0x40] sm:$0xff]  ;;  %v846_v42 = vperm.slane %v2297_v36, 1 }
 0x1d1   : > { %v2332_v49 = vadd.f32 %v799_v46, %v2270_v2 }
 0x1d4   : > { %v771_v44 = vpop.f32.mrf.mxu3  ;;  %v800_v45 = vpop.f32.mrf.mxu0 }
 0x1d5   : > { %v772_v47 = vadd.f32 %v771_v44, %v2327_v41 }
 0x1d7   : > { %v801_v48 = vadd.f32 %v800_v45, %v772_v47 }
 0x1d9   : > { %v2335_v50 = vadd.f32 %v801_v48, %v2272_v3 }
 0x1db   : > { %v826_v51 = vpack.c.bf16 %v2335_v50, %v2332_v49 }
 0x1dc   : > { %v774_v52 = vpop.f32.mrf.mxu3  ;;  %v803_v53 = vpop.f32.mrf.mxu0 }
 0x1dd   : > { %936 = vmatmul.bf16.vlgmr.msra.gmra.mxu1 %v826_v51  ;;  %965 = vmatmul.bf16.vlgmr.msrb.gmra.mxu2 %v826_v51  ;;  %v775_v54 = vadd.f32 %v774_v52, %v2327_v41 }
 0x1df   : > { %v804_v57 = vadd.f32 %v803_v53, %v775_v54 }
 0x1e1   : > { %v2342_v2 = vadd.f32 %v804_v57, %v2276_v8  ;;  %v1701_v8 = vld [vmem:[#allocation8 + $0x28] sm:$0xff] }
 0x1e2   : > { %1141 = vmatpush.bf16.msrb.mxu3 %v1701_v8 }
 0x1e4   : > { %v776_v55 = vpop.f32.mrf.mxu3  ;;  %v805_v56 = vpop.f32.mrf.mxu0 }
 0x1e5   : > { %v777_v58 = vadd.f32 %v776_v55, %v2327_v41 }
 0x1e6   : > { %1142 = vmatpush.bf16.msrb.mxu3 %v1700_v14 }
 0x1e7   : > { %v806_v59 = vadd.f32 %v805_v56, %v777_v58 }
 0x1e9   : > { %v2345_v3 = vadd.f32 %v806_v59, %v2278_v9  ;;  %v1709_v9 = vld [vmem:[#allocation8 + $0x68] sm:$0xff] }
 0x1ea   : > { %1170 = vmatpush.bf16.msra.mxu0 %v1709_v9  ;;  %1143 = vmatpush.bf16.msrb.mxu3 %v1699_v21 }
 0x1eb   : > { %v827_v60 = vpack.c.bf16 %v2345_v3, %v2342_v2 }
 0x1ec   : > { %v779_v61 = vpop.f32.mrf.mxu3  ;;  %v808_v62 = vpop.f32.mrf.mxu0 }
 0x1ed   : > { %941 = vmatmul.bf16.gmra.mxu1 %v827_v60  ;;  %970 = vmatmul.bf16.gmra.mxu2 %v827_v60  ;;  %v780_v6 = vadd.f32 %v779_v61, %v2327_v41 }
 0x1ee   : > { %1171 = vmatpush.bf16.msra.mxu0 %v1708_v15  ;;  %1144 = vmatpush.bf16.msrb.mxu3 %v1698_v27 }
 0x1ef   : > { %v809_v11 = vadd.f32 %v808_v62, %v780_v6 }
 0x1f1   : > { %v2352_v16 = vadd.f32 %v809_v11, %v2282_v18 }
 0x1f2   : > { %1172 = vmatpush.bf16.msra.mxu0 %v1707_v22 }
 0x1f4   : > { %v781_v7 = vpop.f32.mrf.mxu3  ;;  %v810_v10 = vpop.f32.mrf.mxu0 }
 0x1f5   : > { %v782_v12 = vadd.f32 %v781_v7, %v2327_v41 }
 0x1f6   : > { %1173 = vmatpush.bf16.msra.mxu0 %v1706_v38 }
 0x1f7   : > { %v811_v13 = vadd.f32 %v810_v10, %v782_v12 }
 0x1f9   : > { %v2355_v17 = vadd.f32 %v811_v13, %v2284_v19  ;;  %v1697_v19 = vld [vmem:[#allocation8 + $0x8] sm:$0xff] }
 0x1fa   : > { %1145 = vmatpush.bf16.msrb.mxu3 %v1697_v19  ;;  %1174 = vmatpush.bf16.msra.mxu0 %v1705_v43 }
 0x1fb   : > { %v828_v20 = vpack.c.bf16 %v2355_v17, %v2352_v16 }
 0x1fc   : > { %v784_v23 = vpop.f32.mrf.mxu3  ;;  %v813_v26 = vpop.f32.mrf.mxu0 }
 0x1fd   : > { %946 = vmatmul.bf16.gmra.mxu1 %v828_v20  ;;  %975 = vmatmul.bf16.gmra.mxu2 %v828_v20  ;;  %v785_v18 = vadd.f32 %v784_v23, %v2327_v41 }
 0x1fe   : > { %1146 = vmatpush.bf16.msrb.mxu3 %v1696_v37  ;;  %1175 = vmatpush.bf16.msra.mxu0 %v1704_v40 }
 0x1ff   : > { %v814_v29 = vadd.f32 %v813_v26, %v785_v18 }
 0x201   : > { %v2362_v33 = vadd.f32 %v814_v29, %v2288_v24 }
 0x204   : > { %v786_v28 = vpop.f32.mrf.mxu3  ;;  %v815_v31 = vpop.f32.mrf.mxu0 }
 0x205   : > { %v787_v30 = vadd.f32 %v786_v28, %v2327_v41 }
 0x207   : > { %v816_v32 = vadd.f32 %v815_v31, %v787_v30 }
 0x209   : > { %v2365_v34 = vadd.f32 %v816_v32, %v2290_v25  ;;  %v847_v25 = vperm.slane %v2305_v39, 1 }
 0x20b   : > { %v829_v35 = vpack.c.bf16 %v2365_v34, %v2362_v33 }
 0x20d   : > { %951 = vmatmul.bf16.gmra.mxu1 %v829_v35  ;;  %980 = vmatmul.bf16.gmra.mxu2 %v829_v35 }
 0x25a   : > { %v937_v41 = vpop.f32.mrf.mxu1 }
 0x25b   : > { %v938_v24 = vadd.f32 %v937_v41, %v846_v42 }
 0x25d   : > { %v986_v47 = vmax.f32 %v938_v24, 0.0 }
 0x260   : > { %v966_v44 = vpop.f32.mrf.mxu2 }
 0x261   : > { %v967_v51 = vadd.f32 %v966_v44, %v847_v25 }
 0x262   : > { %v939_v45 = vpop.f32.mrf.mxu1 }
 0x263   : > { %v940_v46 = vadd.f32 %v939_v45, %v846_v42  ;;  %v987_v56 = vmax.f32 %v967_v51, 0.0  ;;  %v2372_v45 = vperm.slane %v2267_v63, 2  ;;  %v2376_v51 = vperm.slane %v2267_v63, 3 }
 0x265   : > { %v988_v48 = vmax.f32 %v940_v46, 0.0 }
 0x267   : > { %v1002_v52 = vpack.c.bf16 %v988_v48, %v986_v47 }
 0x268   : > { %v968_v53 = vpop.f32.mrf.mxu2 }
 0x269   : > { %v969_v54 = vadd.f32 %v968_v53, %v847_v25  ;;  %1147 = vmatmul.bf16.vlgmr.msrb.gmra.mxu3 %v1002_v52 }
 0x26a   : > { %v942_v55 = vpop.f32.mrf.mxu1 }
 0x26b   : > { %v989_v57 = vmax.f32 %v969_v54, 0.0  ;;  %v943_v36 = vadd.f32 %v942_v55, %v846_v42 }
 0x26d   : > { %v1003_v58 = vpack.c.bf16 %v989_v57, %v987_v56  ;;  %v990_v62 = vmax.f32 %v943_v36, 0.0 }
 0x26f   : > { %1176 = vmatmul.bf16.vlgmr.msra.gmra.mxu0 %v1003_v58 }
 0x270   : > { %v971_v59 = vpop.f32.mrf.mxu2 }
 0x271   : > { %v972_v39 = vadd.f32 %v971_v59, %v847_v25 }
 0x272   : > { %v944_v60 = vpop.f32.mrf.mxu1 }
 0x273   : > { %v945_v61 = vadd.f32 %v944_v60, %v846_v42  ;;  %v991_v8 = vmax.f32 %v972_v39, 0.0 }
 0x275   : > { %v992_v0 = vmax.f32 %v945_v61, 0.0 }
 0x277   : > { %v1004_v1 = vpack.c.bf16 %v992_v0, %v990_v62 }
 0x278   : > { %v973_v4 = vpop.f32.mrf.mxu2 }
 0x279   : > { %v974_v5 = vadd.f32 %v973_v4, %v847_v25  ;;  %1152 = vmatmul.bf16.gmra.mxu3 %v1004_v1 }
 0x27a   : > { %v947_v6 = vpop.f32.mrf.mxu1 }
 0x27b   : > { %v993_v9 = vmax.f32 %v974_v5, 0.0  ;;  %v948_v11 = vadd.f32 %v947_v6, %v846_v42 }
 0x27d   : > { %v1005_v7 = vpack.c.bf16 %v993_v9, %v991_v8  ;;  %v994_v14 = vmax.f32 %v948_v11, 0.0 }
 0x27f   : > { %1181 = vmatmul.bf16.gmra.mxu0 %v1005_v7 }
 0x280   : > { %v976_v10 = vpop.f32.mrf.mxu2 }
 0x281   : > { %v977_v20 = vadd.f32 %v976_v10, %v847_v25 }
 0x282   : > { %v949_v12 = vpop.f32.mrf.mxu1 }
 0x283   : > { %v950_v13 = vadd.f32 %v949_v12, %v846_v42  ;;  %v995_v27 = vmax.f32 %v977_v20, 0.0 }
 0x285   : > { %v996_v15 = vmax.f32 %v950_v13, 0.0 }
 0x287   : > { %v1006_v21 = vpack.c.bf16 %v996_v15, %v994_v14 }
 0x288   : > { %v978_v22 = vpop.f32.mrf.mxu2 }
 0x289   : > { %v979_v23 = vadd.f32 %v978_v22, %v847_v25  ;;  %1157 = vmatmul.bf16.gmra.mxu3 %v1006_v21 }
 0x28a   : > { %v952_v26 = vpop.f32.mrf.mxu1 }
 0x28b   : > { %v997_v38 = vmax.f32 %v979_v23, 0.0  ;;  %v953_v28 = vadd.f32 %v952_v26, %v846_v42 }
 0x28d   : > { %v1007_v18 = vpack.c.bf16 %v997_v38, %v995_v27  ;;  %v998_v31 = vmax.f32 %v953_v28, 0.0 }
 0x28f   : > { %1186 = vmatmul.bf16.gmra.mxu0 %v1007_v18 }
 0x290   : > { %v981_v19 = vpop.f32.mrf.mxu2 }
 0x291   : > { %v982_v35 = vadd.f32 %v981_v19, %v847_v25 }
 0x292   : > { %v954_v29 = vpop.f32.mrf.mxu1 }
 0x293   : > { %v955_v30 = vadd.f32 %v954_v29, %v846_v42  ;;  %v999_v41 = vmax.f32 %v982_v35, 0.0 }
 0x295   : > { %v1000_v32 = vmax.f32 %v955_v30, 0.0 }
 0x297   : > { %v1008_v37 = vpack.c.bf16 %v1000_v32, %v998_v31 }
 0x298   : > { %v983_v43 = vpop.f32.mrf.mxu2 }
 0x299   : > { %v984_v40 = vadd.f32 %v983_v43, %v847_v25  ;;  %1162 = vmatmul.bf16.gmra.mxu3 %v1008_v37  ;;  %v2381_v25 = vperm.slane %v2267_v63, 4 }
 0x29b   : > { %v1001_v44 = vmax.f32 %v984_v40, 0.0 }
 0x29d   : > { %v1009_v24 = vpack.c.bf16 %v1001_v44, %v999_v41 }
 0x29f   : > { %1191 = vmatmul.bf16.gmra.mxu0 %v1009_v24 }
 0x2ec   : > { %v1148_v46 = vpop.f32.mrf.mxu3  ;;  %v1177_v47 = vpop.f32.mrf.mxu0 }
 0x2ed   : > { %v1149_v42 = vadd.f32 %v1148_v46, %v2372_v45 }
 0x2ef   : > { %v1178_v48 = vadd.f32 %v1177_v47, %v1149_v42 }
 0x2f1   : > { %v1197_v52 = vadd.f32 %v1178_v48, %v2332_v49 }
 0x2f3   : > { %v1206_v53 = vmul.f32 %v2376_v51, %v1197_v52 }
 0x2f4   : > { %v1150_v54 = vpop.f32.mrf.mxu3  ;;  %v1179_v55 = vpop.f32.mrf.mxu0 }
 0x2f5   : > { %v1215_v56 = vadd.f32 %v2381_v25, %v1206_v53  ;;  %v1151_v57 = vadd.f32 %v1150_v54, %v2372_v45 }
 0x2f7   : > { %v1223_v58 = vmax.f32 %v1215_v56, 0.0  ;;  %v1180_v59 = vadd.f32 %v1179_v55, %v1151_v57 }
 0x2f9   : > { %1231 = vst [vmem:[%s2388_s12] sm:$0xff] %v1223_v58  ;;  %v1198_v63 = vadd.f32 %v1180_v59, %v2335_v50 }
 0x2fb   : > { %v1207_v49 = vmul.f32 %v2376_v51, %v1198_v63 }
 0x2fc   : > { %v1153_v36 = vpop.f32.mrf.mxu3  ;;  %v1182_v60 = vpop.f32.mrf.mxu0 }
 0x2fd   : > { %v1216_v61 = vadd.f32 %v2381_v25, %v1207_v49  ;;  %v1154_v62 = vadd.f32 %v1153_v36, %v2372_v45 }
 0x2ff   : > { %v1224_v0 = vmax.f32 %v1216_v61, 0.0  ;;  %v1183_v39 = vadd.f32 %v1182_v60, %v1154_v62 }
 0x301   : > { %1232 = vst [vmem:[%s2388_s12 + $0x8] sm:$0xff] %v1224_v0  ;;  %v1199_v1 = vadd.f32 %v1183_v39, %v2342_v2 }
 0x303   : > { %v1208_v4 = vmul.f32 %v2376_v51, %v1199_v1 }
 0x304   : > { %v1155_v5 = vpop.f32.mrf.mxu3  ;;  %v1184_v6 = vpop.f32.mrf.mxu0 }
 0x305   : > { %v1217_v50 = vadd.f32 %v2381_v25, %v1208_v4  ;;  %v1156_v8 = vadd.f32 %v1155_v5, %v2372_v45 }
 0x307   : > { %v1225_v9 = vmax.f32 %v1217_v50, 0.0  ;;  %v1185_v7 = vadd.f32 %v1184_v6, %v1156_v8 }
 0x309   : > { %1233 = vst [vmem:[%s2388_s12 + $0x10] sm:$0xff] %v1225_v9  ;;  %v1200_v10 = vadd.f32 %v1185_v7, %v2345_v3 }
 0x30b   : > { %v1209_v11 = vmul.f32 %v2376_v51, %v1200_v10 }
 0x30c   : > { %v1158_v12 = vpop.f32.mrf.mxu3  ;;  %v1187_v13 = vpop.f32.mrf.mxu0 }
 0x30d   : > { %v1218_v2 = vadd.f32 %v2381_v25, %v1209_v11  ;;  %v1159_v14 = vadd.f32 %v1158_v12, %v2372_v45 }
 0x30f   : > { %v1226_v15 = vmax.f32 %v1218_v2, 0.0  ;;  %v1188_v20 = vadd.f32 %v1187_v13, %v1159_v14 }
 0x311   : > { %1234 = vst [vmem:[%s2388_s12 + $0x18] sm:$0xff] %v1226_v15  ;;  %v1201_v21 = vadd.f32 %v1188_v20, %v2352_v16 }
 0x313   : > { %v1210_v22 = vmul.f32 %v2376_v51, %v1201_v21 }
 0x314   : > { %v1160_v23 = vpop.f32.mrf.mxu3  ;;  %v1189_v26 = vpop.f32.mrf.mxu0 }
 0x315   : > { %v1219_v3 = vadd.f32 %v2381_v25, %v1210_v22  ;;  %v1161_v27 = vadd.f32 %v1160_v23, %v2372_v45 }
 0x317   : > { %v1227_v38 = vmax.f32 %v1219_v3, 0.0  ;;  %v1190_v18 = vadd.f32 %v1189_v26, %v1161_v27 }
 0x319   : > { %1235 = vst [vmem:[%s2388_s12 + $0x20] sm:$0xff] %v1227_v38  ;;  %v1202_v19 = vadd.f32 %v1190_v18, %v2355_v17 }
 0x31b   : > { %v1211_v28 = vmul.f32 %v2376_v51, %v1202_v19 }
 0x31c   : > { %v1163_v29 = vpop.f32.mrf.mxu3  ;;  %v1192_v30 = vpop.f32.mrf.mxu0 }
 0x31d   : > { %v1220_v16 = vadd.f32 %v2381_v25, %v1211_v28  ;;  %v1164_v31 = vadd.f32 %v1163_v29, %v2372_v45 }
 0x31f   : > { %v1228_v32 = vmax.f32 %v1220_v16, 0.0  ;;  %v1193_v35 = vadd.f32 %v1192_v30, %v1164_v31 }
 0x321   : > { %1236 = vst [vmem:[%s2388_s12 + $0x28] sm:$0xff] %v1228_v32  ;;  %v1203_v37 = vadd.f32 %v1193_v35, %v2362_v33 }
 0x323   : > { %v1212_v43 = vmul.f32 %v2376_v51, %v1203_v37 }
 0x324   : > { %v1165_v40 = vpop.f32.mrf.mxu3  ;;  %v1194_v44 = vpop.f32.mrf.mxu0 }
 0x325   : > { %v1221_v17 = vadd.f32 %v2381_v25, %v1212_v43  ;;  %v1166_v41 = vadd.f32 %v1165_v40, %v2372_v45 }
 0x327   : > { %v1229_v24 = vmax.f32 %v1221_v17, 0.0  ;;  %v1195_v46 = vadd.f32 %v1194_v44, %v1166_v41 }
 0x329   : > { %1237 = vst [vmem:[%s2388_s12 + $0x30] sm:$0xff] %v1229_v24  ;;  %v1204_v33 = vadd.f32 %v1195_v46, %v2365_v34 }
 0x32b   : > { %v1213_v47 = vmul.f32 %v2376_v51, %v1204_v33 }
 0x32d   : > { %v1222_v42 = vadd.f32 %v2381_v25, %v1213_v47 }
 0x32f   : > { %v1230_v45 = vmax.f32 %v1222_v42, 0.0 }
 0x331   : > { %1238 = vst [vmem:[%s2388_s12 + $0x38] sm:$0xff] %v1230_v45 }
 0x332   : > { %1948 = shalt.err (!%p1945_p8)
}
 0x333   : > { %s2005_s17 = smov 128   ;;  %s2006_s23 = smov 8  }
 0x334   : > { %1731 = dma.vmem_to_hbm [thread:$0]  (%p2090_p5), %s1253_s25, 1024, %s1255_s20, %s1240_s9, %s2005_s17, %s2005_s17, %s2006_s23  }
 0x335 PF: > { %p1758_p9 = scmp.ge.s32.totalorder %s1995_s30, 2  ;;  %s1269_s26 = sand.u32 1, %s1983_s27  }
 0x336   : > { %s1270_s10 = scalar_lea.sflag [#allocation4], %s1269_s26 }
 0x337   : > { %p1747_p10 = pnand %p1758_p9, %p2094_p6 }
 0x339   : > { %p1748_p11 = pneg %p1747_p10 }
 0x33b   : > { %1978 = dma.done.wait (%p1748_p11), %s1270_s10, 1024  }
 0x33c   : > { %1980 = vsyncadd (%p1748_p11), %s1270_s10, 4294966272  ;;  %s2482_s30 = sld [smem:[#allocation16_spill]]  ;;  %s2485_s27 = smov %s1987_s28 }
 0x33d   : > { %s2483_s12 = sld [smem:[#allocation15_spill]] }
 0x33e   : > { %s2484_s29 = sld [smem:[#allocation17_spill]] }
 0x342   : > { %p21_p12 = scmp.ge.s32.totalorder %s2482_s30, 4  }
 0x343   : > { %s2486_s28 = smov %s2483_s12 }
 0x344   :  { %23 = sbr.rel (!%p21_p12) target bundleno = 9 (0x9), region = 104 }
 0x349   :  { %1276 = vsyncpa [#allocation3], 1 }
 0x34a   :  { %1278 = vsyncpa [#allocation3 + $0x1], 1 }
 0x34b   :  { %1279 = vsyncpa [#allocation6], 1 }
 0x34c   :  { %1280 = vsyncpa [#allocation9], 1 }
 0x34d   :  { %1281 = vsyncpa [#allocation4], 1 }
 0x34e   :  { %1283 = vsyncpa [#allocation4 + $0x1], 1 }

</bundles_post_ra>
